<compile_context>
chip_gen: v6e
topology: v6e:2x2x1
jax: 0.10.0
libtpu: 0.0.40
codegen_flags: <defaults>
</compile_context>

<pallas_src>
import math

import jax
import jax.numpy as jnp
from jax.experimental import pallas as pl
from jax.experimental.pallas import tpu as pltpu

LATENT_DIM = 64


def _identity_copy_kernel(x_ref, o_ref):
    # Whole-tile VMEM copy: one vld + one vst stream per tile, no compute.
    o_ref[...] = x_ref[...]


def _pallas_identity_2d(x2d: jax.Array) -> jax.Array:
    """Identity copy of a lane-dense 2-D slab (last dim is a multiple of 128)."""
    rows, cols = x2d.shape

    # Pick a row-tile size: whole array if small, otherwise big tiles
    # (512-1024 rows) that divide `rows` and are sublane-aligned (multiple
    # of 8) so the (8,128) block constraint is satisfied.
    tile_rows = rows
    if rows > 1024:
        for cand in (1024, 512, 256, 128, 64, 32, 16, 8):
            if rows % cand == 0:
                tile_rows = cand
                break

    grid = (rows // tile_rows,)
    return pl.pallas_call(
        _identity_copy_kernel,
        out_shape=jax.ShapeDtypeStruct((rows, cols), x2d.dtype),
        grid=grid,
        in_specs=[pl.BlockSpec((tile_rows, cols), lambda i: (i, 0))],
        out_specs=pl.BlockSpec((tile_rows, cols), lambda i: (i, 0)),
        compiler_params=pltpu.CompilerParams(
            dimension_semantics=("parallel",)),
    )(x2d)


def fake_net_forward(x: jax.Array) -> jax.Array:
    """FakeNet.forward(x) == x, implemented as a Pallas copy kernel.

    NOTE (perf): outside of this exercise, simply `return x` — the identity
    needs no kernel and no HBM traffic.  This wrapper keeps a lane-dense,
    tiled copy kernel because a pallas_call is required here.
    """
    n_elems = math.prod(x.shape) if x.shape else 1

    if n_elems >= 128 and n_elems % 128 == 0:
        # Lane-dense path: present a (rows, 128) slab so stores are unmasked.
        rows = n_elems // 128
        y = _pallas_identity_2d(x.reshape(rows, 128))
        return y.reshape(x.shape)

    # Fallback: full-array single block (block_shape == array shape, so the
    # (8,128) divisibility rule does not apply).  Only hit for tiny/odd shapes.
    return pl.pallas_call(
        _identity_copy_kernel,
        out_shape=jax.ShapeDtypeStruct(x.shape, x.dtype),
        in_specs=[pl.BlockSpec(memory_space=pltpu.MemorySpace.VMEM)],
        out_specs=pl.BlockSpec(memory_space=pltpu.MemorySpace.VMEM),
    )(x)


class FakeNetPallas:
    """Mirror of the PyTorch FakeNet module (no trainable parameters used)."""

    def __init__(self, latent_dim: int, action_dim: int):
        self.latent_dim = latent_dim
        self.action_dim = action_dim
        self.linear = None  # matches PyTorch: never initialized / never used

    def __call__(self, x: jax.Array) -> jax.Array:
        return fake_net_forward(x)


if __name__ == "__main__":
    key = jax.random.PRNGKey(0)
    batch = 8
    action_dim = 4
    x = jax.random.normal(key, (batch, LATENT_DIM), dtype=jnp.float32)

    net = FakeNetPallas(LATENT_DIM, action_dim)
    out = jax.block_until_ready(net(x))

    # Correctness: forward is the identity.
    assert out.shape == x.shape and out.dtype == x.dtype
    assert bool(jnp.array_equal(out, x))

    print("KERNEL_OK")
</pallas_src>

<mosaic_0001>
module attributes {stable_mosaic.version = 11 : i64} {
  func.func @_identity_copy_kernel(%arg0: i32, %arg1: memref<4x128xf32, #tpu.memory_space<vmem>>, %arg2: memref<4x128xf32, #tpu.memory_space<vmem>>) attributes {dimension_semantics = [#tpu.dimension_semantics<parallel>], iteration_bounds = array<i64: 1>, scalar_prefetch = 0 : i64, scratch_operands = 0 : i64, tpu.core_type = #tpu.core_type<tc>, window_params = [{transform_indices = @transform_0, window_bounds = array<i64: 4, 128>}, {transform_indices = @transform_1, window_bounds = array<i64: 4, 128>}]} {
    %c0 = arith.constant 0 : index
    %c0_0 = arith.constant 0 : index
    %0 = vector.load %arg1[%c0, %c0_0] : memref<4x128xf32, #tpu.memory_space<vmem>>, vector<4x128xf32>
    %c0_1 = arith.constant 0 : index
    %c0_2 = arith.constant 0 : index
    %1 = vector.load %arg2[%c0_1, %c0_2] : memref<4x128xf32, #tpu.memory_space<vmem>>, vector<4x128xf32>
    tpu.vector_store %arg2[%c0_1, %c0_2], %0 {strides = array<i32>} : memref<4x128xf32, #tpu.memory_space<vmem>>, vector<4x128xf32>,
    return
  }
  func.func @transform_0(%arg0: i32) -> (i32, i32) {
    %c0_i32 = arith.constant 0 : i32
    %c0_i32_0 = arith.constant 0 : i32
    return %arg0, %c0_i32 : i32, i32
  }
  func.func @transform_1(%arg0: i32) -> (i32, i32) {
    %c0_i32 = arith.constant 0 : i32
    %c0_i32_0 = arith.constant 0 : i32
    return %arg0, %c0_i32 : i32, i32
  }
}

</mosaic_0001>

<bundles_post_ra>
// kernel: tpu_custom_call.1
= control target key start
LH: loop header
LB: loop body
LE: loop exit
PB: predicated region body
PF: predicated region fallthrough
CT: control target
= control target key end

     0   :  { %6 = vsyncpa [#allocation3], 0  ;;  %s102_s0 = inlined_call_operand.hbm [shape: f32[4,128], index: 0, kind: input, shape index: {}]   ;;  %s103_s1 = inlined_call_operand.hbm [shape: f32[4,128], index: 1, kind: output, shape index: {}]  }
   0x1   :  { %7 = vsyncpa [#allocation4], 0  ;;  %s84_s6 = smov [#allocation2]  }
   0x2   :  { %s14_s7 = sshll.u32 %s84_s6, 4  ;;  %s15_s7 = int_to_ptr.vmem [resolvable:$true] %s14_s7 }
   0x3   :  { %s48_s8 = scalar_lea.vmem %s15_s7, 64  ;;  %p53_p1 = scmp.lt.s32.totalorder %s15_s7, %s15_s7 }
   0x4   :  { %p49_p0 = scmp.ne.s32.totalorder %s15_s7, %s48_s8  ;;  %p54_p2 = scmp.lt.s32.totalorder %s48_s8, %s48_s8 }
   0x6   :  { %p55_p3 = por %p54_p2, %p53_p1 }
   0x8   :  { %p56_p4 = pnand %p55_p3, %p49_p0 }
   0xa   :  { %59 = shalt.err (!%p56_p4)
}
   0xb   :  { %17 = dma.hbm_to_vmem [thread:$0]  %s102_s0, 64, %s15_s7, [#allocation3]  }
   0xc   :  { %80 = dma.done.wait [#allocation3], 64  }
   0xd   :  { %81 = vsyncadd [#allocation3], 4294967232  ;;  %s85_s11 = smov [#allocation5]   ;;  %v21_v0 = vld [vmem:[#allocation2] sm:$0xf] }
   0xe   :  { %s29_s12 = sshll.u32 %s85_s11, 4  ;;  %22 = vst [vmem:[#allocation5] sm:$0xf] %v21_v0  ;;  %s30_s12 = int_to_ptr.vmem [resolvable:$true] %s29_s12 }
   0xf   :  { %s60_s13 = scalar_lea.vmem %s30_s12, 64  ;;  %p65_p6 = scmp.lt.s32.totalorder %s30_s12, %s30_s12 }
  0x10   :  { %p61_p5 = scmp.ne.s32.totalorder %s30_s12, %s60_s13  ;;  %p66_p7 = scmp.lt.s32.totalorder %s60_s13, %s60_s13 }
  0x12   :  { %p67_p8 = por %p66_p7, %p65_p6 }
  0x14   :  { %p68_p9 = pnand %p67_p8, %p61_p5 }
  0x16   :  { %71 = shalt.err (!%p68_p9)
}
  0x17   :  { %32 = dma.vmem_to_hbm [thread:$0]  %s30_s12, 64, %s103_s1, [#allocation4]  }
  0x18   :  { %82 = dma.done.wait [#allocation4], 64  }
  0x19   :  { %83 = vsyncadd [#allocation4], 4294967232 }
  0x1a   :  { %36 = vsyncpa [#allocation3], 1 }
  0x1b   :  { %37 = vsyncpa [#allocation4], 1 }

</bundles_post_ra>
